<compile_context>
chip_gen: v5e
topology: v5e:2x2
jax: 0.10.0
libtpu: 0.0.40
codegen_flags: <defaults>
</compile_context>

<pallas_src>
import functools

import jax
import jax.numpy as jnp
from jax.experimental import pallas as pl
from jax.experimental.pallas import tpu as pltpu

# Fits within the default scoped-VMEM budget on v5e/v6e/v7x (explicit per review).
_VMEM_LIMIT = 32 * 1024 * 1024


def _pick_tile(dim, target, step=128):
    """Largest tile <= target that evenly divides `dim` (prefers multiples of
    `step`); falls back to the full axis so block shapes stay legal."""
    if dim <= target:
        return dim
    t = (target // step) * step
    while t >= step:
        if dim % t == 0:
            return t
        t -= step
    return dim


# ---------------------------------------------------------------------------
# Tiled matmul (nn.Linear without bias: x @ W^T; weights stored as W^T)
# ---------------------------------------------------------------------------
def _matmul_kernel(x_ref, w_ref, o_ref, acc_ref):
    @pl.when(pl.program_id(2) == 0)
    def _init():
        acc_ref[...] = jnp.zeros_like(acc_ref)

    acc_ref[...] += jnp.dot(
        x_ref[...], w_ref[...], preferred_element_type=jnp.float32
    )

    @pl.when(pl.program_id(2) == pl.num_programs(2) - 1)
    def _store():
        o_ref[...] = acc_ref[...].astype(o_ref.dtype)


def pallas_matmul(x, w, *, tm=512, tn=512, tk=512):
    M, K = x.shape
    K2, N = w.shape
    assert K == K2
    tm = _pick_tile(M, tm)
    tn = _pick_tile(N, tn)
    tk = _pick_tile(K, tk)
    return pl.pallas_call(
        _matmul_kernel,
        out_shape=jax.ShapeDtypeStruct((M, N), x.dtype),
        grid=(M // tm, N // tn, K // tk),
        in_specs=[
            pl.BlockSpec((tm, tk), lambda i, j, k: (i, k)),
            pl.BlockSpec((tk, tn), lambda i, j, k: (k, j)),
        ],
        out_specs=pl.BlockSpec((tm, tn), lambda i, j, k: (i, j)),
        scratch_shapes=[pltpu.VMEM((tm, tn), jnp.float32)],
        compiler_params=pltpu.CompilerParams(
            dimension_semantics=("parallel", "parallel", "arbitrary"),
            vmem_limit_bytes=_VMEM_LIMIT,
        ),
    )(x, w)


# ---------------------------------------------------------------------------
# Scaled dot-product attention: all heads of one batch per grid step
# ---------------------------------------------------------------------------
def _sdpa_body(q_ref, k_ref, v_ref, mask_ref, out_ref, attn_ref, inv_temperature):
    q = q_ref[0]  # (H, tq, d_k)
    q = q * jnp.asarray(inv_temperature, dtype=q.dtype)  # scale q, not the LxL scores
    k = k_ref[0]  # (H, Lk, d_k)
    v = v_ref[0]  # (H, Lk, d_v)

    # scores[h, q, k] = sum_d q[h, q, d] * k[h, k, d]  (no materialized k.T)
    scores = jnp.einsum("hqd,hkd->hqk", q, k, preferred_element_type=jnp.float32)

    if mask_ref is not None:
        m = mask_ref[0]  # (tq, Lk) -- broadcast over heads
        scores = jnp.where(m[None, :, :] == 0, jnp.float32(-1e9), scores)

    scores = scores - jnp.max(scores, axis=-1, keepdims=True)
    p = jnp.exp(scores)
    attn = p * pl.reciprocal(jnp.sum(p, axis=-1, keepdims=True), approx=True)

    attn_ref[0] = attn.astype(attn_ref.dtype)
    out = jnp.einsum(
        "hqk,hkd->hqd", attn.astype(v.dtype), v, preferred_element_type=jnp.float32
    )
    out_ref[0] = out.astype(out_ref.dtype)


def _sdpa_kernel(q_ref, k_ref, v_ref, mask_ref, out_ref, attn_ref, *, inv_temperature):
    _sdpa_body(q_ref, k_ref, v_ref, mask_ref, out_ref, attn_ref, inv_temperature)


def _sdpa_kernel_nomask(q_ref, k_ref, v_ref, out_ref, attn_ref, *, inv_temperature):
    _sdpa_body(q_ref, k_ref, v_ref, None, out_ref, attn_ref, inv_temperature)


def pallas_scaled_dot_product_attention(q, k, v, attn_mask, temperature, *, tq=256):
    # q: (B, H, Lq, d_k), k: (B, H, Lk, d_k), v: (B, H, Lk, d_v)
    # attn_mask: (B, Lq, Lk) or None (0 == masked; broadcast over heads)
    B, H, Lq, dk = q.shape
    Lk = k.shape[2]
    dv = v.shape[3]
    tq = _pick_tile(Lq, tq)
    grid = (B, Lq // tq)
    inv_temperature = 1.0 / float(temperature)

    q_spec = pl.BlockSpec((1, H, tq, dk), lambda b, qi: (b, 0, qi, 0))
    k_spec = pl.BlockSpec((1, H, Lk, dk), lambda b, qi: (b, 0, 0, 0))
    v_spec = pl.BlockSpec((1, H, Lk, dv), lambda b, qi: (b, 0, 0, 0))
    out_specs = (
        pl.BlockSpec((1, H, tq, dv), lambda b, qi: (b, 0, qi, 0)),
        pl.BlockSpec((1, H, tq, Lk), lambda b, qi: (b, 0, qi, 0)),
    )
    out_shape = (
        jax.ShapeDtypeStruct((B, H, Lq, dv), q.dtype),
        # attention weights returned in the input dtype (matches PyTorch)
        jax.ShapeDtypeStruct((B, H, Lq, Lk), q.dtype),
    )
    compiler_params = pltpu.CompilerParams(
        dimension_semantics=("parallel", "parallel"),
        vmem_limit_bytes=_VMEM_LIMIT,
    )

    if attn_mask is None:
        kernel = functools.partial(_sdpa_kernel_nomask, inv_temperature=inv_temperature)
        out, attn = pl.pallas_call(
            kernel,
            out_shape=out_shape,
            grid=grid,
            in_specs=[q_spec, k_spec, v_spec],
            out_specs=out_specs,
            compiler_params=compiler_params,
        )(q, k, v)
    else:
        kernel = functools.partial(_sdpa_kernel, inv_temperature=inv_temperature)
        m_spec = pl.BlockSpec((1, tq, Lk), lambda b, qi: (b, qi, 0))
        out, attn = pl.pallas_call(
            kernel,
            out_shape=out_shape,
            grid=grid,
            in_specs=[q_spec, k_spec, v_spec, m_spec],
            out_specs=out_specs,
            compiler_params=compiler_params,
        )(q, k, v, attn_mask)
    return out, attn


# ---------------------------------------------------------------------------
# MultiHeadAttention forward (glue in plain JAX, compute in Pallas)
# ---------------------------------------------------------------------------
def multi_head_attention_forward(params, q, k, v, attn_mask):
    """Mirrors MultiHeadAttention.forward.

    q, k, v: [batch, seq, d_model]; attn_mask: [batch, seq, seq] or None.
    Returns (output [batch, seq, d_model], attn_weights [batch, n_heads, seq, seq]).
    """
    n_heads = params["n_heads"]
    d_k = params["d_k"]
    d_v = params["d_v"]

    B, Lq, d_model = q.shape
    Lk = k.shape[1]
    Lv = v.shape[1]

    if (q is k) and (k is v):
        # Self-attention: fuse the three projections into one tiled matmul
        # (lane-dense output, single DMA of the activations).
        w_qkv = jnp.concatenate(
            [params["w_qs"], params["w_ks"], params["w_vs"]], axis=1
        )
        qkv = pallas_matmul(q.reshape(B * Lq, d_model), w_qkv)
        hk = n_heads * d_k
        q_p = qkv[:, :hk]
        k_p = qkv[:, hk : 2 * hk]
        v_p = qkv[:, 2 * hk :]
    else:
        q_p = pallas_matmul(q.reshape(B * Lq, d_model), params["w_qs"])
        k_p = pallas_matmul(k.reshape(B * Lk, d_model), params["w_ks"])
        v_p = pallas_matmul(v.reshape(B * Lv, d_model), params["w_vs"])

    # view + transpose(1, 2): -> (B, H, L, d)   (kept as XLA glue, see TODO above)
    q_h = q_p.reshape(B, Lq, n_heads, d_k).transpose(0, 2, 1, 3)
    k_h = k_p.reshape(B, Lk, n_heads, d_k).transpose(0, 2, 1, 3)
    v_h = v_p.reshape(B, Lv, n_heads, d_v).transpose(0, 2, 1, 3)

    temperature = float(d_k) ** 0.5
    out_h, attn_weights = pallas_scaled_dot_product_attention(
        q_h, k_h, v_h, attn_mask, temperature
    )

    # transpose back + concat heads + final projection
    out = out_h.transpose(0, 2, 1, 3).reshape(B * Lq, n_heads * d_v)
    out = pallas_matmul(out, params["fc"])  # (B*Lq, d_model)
    out = out.reshape(B, Lq, d_model)
    return out, attn_weights


def init_params(key, n_heads, d_model, d_k, d_v, dtype=jnp.float32):
    k1, k2, k3, k4 = jax.random.split(key, 4)
    scale = 1.0 / (d_model ** 0.5)
    # Stored as W^T: (in_features, out_features)
    return {
        "n_heads": n_heads,
        "d_k": d_k,
        "d_v": d_v,
        "w_qs": (jax.random.normal(k1, (d_model, n_heads * d_k)) * scale).astype(dtype),
        "w_ks": (jax.random.normal(k2, (d_model, n_heads * d_k)) * scale).astype(dtype),
        "w_vs": (jax.random.normal(k3, (d_model, n_heads * d_v)) * scale).astype(dtype),
        "fc": (jax.random.normal(k4, (n_heads * d_v, d_model)) * scale).astype(dtype),
    }


if __name__ == "__main__":
    B, L, d_model = 2, 8, 32
    n_heads, d_k, d_v = 4, 8, 8

    key = jax.random.PRNGKey(0)
    kp, kx, kk, kv = jax.random.split(key, 4)

    params = init_params(kp, n_heads, d_model, d_k, d_v)
    x = jax.random.normal(kx, (B, L, d_model), dtype=jnp.float32)

    # Lower-triangular mask (0 = masked), broadcast over heads inside the module.
    attn_mask = jnp.tril(jnp.ones((L, L), dtype=jnp.float32))[None].repeat(B, axis=0)

    # 1) masked self-attention -> fused QKV projection path + mask kernel
    out, attn_weights = multi_head_attention_forward(params, x, x, x, attn_mask)
    # 2) unmasked self-attention -> no-mask kernel variant (no (B,L,L) ones tensor)
    out_nm, attn_nm = multi_head_attention_forward(params, x, x, x, None)
    # 3) cross-attention -> separate projection path
    k_in = jax.random.normal(kk, (B, L, d_model), dtype=jnp.float32)
    v_in = jax.random.normal(kv, (B, L, d_model), dtype=jnp.float32)
    out_x, attn_x = multi_head_attention_forward(params, x, k_in, v_in, attn_mask)

    jax.block_until_ready((out, attn_weights, out_nm, attn_nm, out_x, attn_x))

    assert out.shape == (B, L, d_model)
    assert attn_weights.shape == (B, n_heads, L, L)
    assert out_nm.shape == (B, L, d_model) and out_x.shape == (B, L, d_model)
    assert bool(jnp.all(jnp.isfinite(out)))
    assert bool(jnp.all(jnp.isfinite(attn_weights)))
    # Causal mask => the first query position attends only to itself.
    assert bool(jnp.allclose(attn_weights[:, :, 0, 0], 1.0, atol=1e-3))
    print("KERNEL_OK")
</pallas_src>

<mosaic_0001>
module attributes {stable_mosaic.version = 11 : i64} {
  func.func @_matmul_kernel(%arg0: i32, %arg1: i32, %arg2: i32, %arg3: memref<16x32xf32, #tpu.memory_space<vmem>>, %arg4: memref<32x96xf32, #tpu.memory_space<vmem>>, %arg5: memref<16x96xf32, #tpu.memory_space<vmem>>, %arg6: memref<16x96xf32, #tpu.memory_space<vmem>>) attributes {dimension_semantics = [#tpu.dimension_semantics<parallel>, #tpu.dimension_semantics<parallel>, #tpu.dimension_semantics<arbitrary>], iteration_bounds = array<i64: 1, 1, 1>, scalar_prefetch = 0 : i64, scratch_operands = 1 : i64, tpu.core_type = #tpu.core_type<tc>, window_params = [{transform_indices = @transform_0, window_bounds = array<i64: 16, 32>}, {transform_indices = @transform_1, window_bounds = array<i64: 32, 96>}, {transform_indices = @transform_2, window_bounds = array<i64: 16, 96>}]} {
    %c0_i32 = arith.constant 0 : i32
    %0 = arith.cmpi eq, %arg2, %c0_i32 : i32
    %1 = arith.extui %0 : i1 to i32
    %c0_i32_0 = arith.constant 0 : i32
    %2 = arith.cmpi ne, %1, %c0_i32_0 : i32
    scf.if %2 {
      %cst_10 = arith.constant 0.000000e+00 : f32
      %12 = vector.broadcast %cst_10 : f32 to vector<16x96xf32>
      %c0_11 = arith.constant 0 : index
      %c0_12 = arith.constant 0 : index
      %13 = vector.load %arg6[%c0_11, %c0_12] : memref<16x96xf32, #tpu.memory_space<vmem>>, vector<16x96xf32>
      tpu.vector_store %arg6[%c0_11, %c0_12], %12 {strides = array<i32>} : memref<16x96xf32, #tpu.memory_space<vmem>>, vector<16x96xf32>,
    } else {
    }
    %c0 = arith.constant 0 : index
    %c0_1 = arith.constant 0 : index
    %3 = vector.load %arg6[%c0, %c0_1] : memref<16x96xf32, #tpu.memory_space<vmem>>, vector<16x96xf32>
    %c0_2 = arith.constant 0 : index
    %c0_3 = arith.constant 0 : index
    %4 = vector.load %arg3[%c0_2, %c0_3] : memref<16x32xf32, #tpu.memory_space<vmem>>, vector<16x32xf32>
    %c0_4 = arith.constant 0 : index
    %c0_5 = arith.constant 0 : index
    %5 = vector.load %arg4[%c0_4, %c0_5] : memref<32x96xf32, #tpu.memory_space<vmem>>, vector<32x96xf32>
    %cst = arith.constant dense<0.000000e+00> : vector<16x96xf32>
    %6 = tpu.matmul %4, %5, %cst {dimension_numbers = #tpu.dot_dimension_numbers<[1], [0], [0], [1], [0, 0, 1, 1], [], []>} : vector<16x32xf32>, vector<32x96xf32>, vector<16x96xf32> -> vector<16x96xf32>
    %7 = arith.addf %3, %6 : vector<16x96xf32>
    %c0_6 = arith.constant 0 : index
    %c0_7 = arith.constant 0 : index
    %8 = vector.load %arg6[%c0_6, %c0_7] : memref<16x96xf32, #tpu.memory_space<vmem>>, vector<16x96xf32>
    tpu.vector_store %arg6[%c0_6, %c0_7], %7 {strides = array<i32>} : memref<16x96xf32, #tpu.memory_space<vmem>>, vector<16x96xf32>,
    %c0_i32_8 = arith.constant 0 : i32
    %9 = arith.cmpi eq, %arg2, %c0_i32_8 : i32
    %10 = arith.extui %9 : i1 to i32
    %c0_i32_9 = arith.constant 0 : i32
    %11 = arith.cmpi ne, %10, %c0_i32_9 : i32
    scf.if %11 {
      %c0_10 = arith.constant 0 : index
      %c0_11 = arith.constant 0 : index
      %12 = vector.load %arg6[%c0_10, %c0_11] : memref<16x96xf32, #tpu.memory_space<vmem>>, vector<16x96xf32>
      %c0_12 = arith.constant 0 : index
      %c0_13 = arith.constant 0 : index
      %13 = vector.load %arg5[%c0_12, %c0_13] : memref<16x96xf32, #tpu.memory_space<vmem>>, vector<16x96xf32>
      tpu.vector_store %arg5[%c0_12, %c0_13], %12 {strides = array<i32>} : memref<16x96xf32, #tpu.memory_space<vmem>>, vector<16x96xf32>,
    } else {
    }
    return
  }
  func.func @transform_0(%arg0: i32, %arg1: i32, %arg2: i32) -> (i32, i32) {
    %c0_i32 = arith.constant 0 : i32
    return %arg0, %arg2 : i32, i32
  }
  func.func @transform_1(%arg0: i32, %arg1: i32, %arg2: i32) -> (i32, i32) {
    %c0_i32 = arith.constant 0 : i32
    return %arg2, %arg1 : i32, i32
  }
  func.func @transform_2(%arg0: i32, %arg1: i32, %arg2: i32) -> (i32, i32) {
    %c0_i32 = arith.constant 0 : i32
    return %arg0, %arg1 : i32, i32
  }
}

</mosaic_0001>

<bundles_post_ra>
// kernel: tpu_custom_call.1
= control target key start
LH: loop header
LB: loop body
LE: loop exit
PB: predicated region body
PF: predicated region fallthrough
CT: control target
= control target key end

     0   :  { %7 = vsyncpa [#allocation4], 0  ;;  %s256_s0 = inlined_call_operand.hbm [shape: f32[16,32], index: 0, kind: input, shape index: {}]   ;;  %s257_s1 = inlined_call_operand.hbm [shape: f32[32,96], index: 1, kind: input, shape index: {}]   ;;  %s258_s2 = inlined_call_operand.hbm [shape: f32[16,96], index: 2, kind: output, shape index: {}]  }
   0x1   :  { %8 = vsyncpa [#allocation7], 0 }
   0x2   :  { %9 = vsyncpa [#allocation5], 0  ;;  %s14_s11 = sshll.u32 %s256_s0, 4  ;;  %s211_s12 = smov [#allocation3]   ;;  %s15_s11 = int_to_ptr.hbm [resolvable:$true] %s14_s11 }
   0x3   :  { %s16_s13 = sshll.u32 %s211_s12, 4  ;;  %s27_s16 = sshll.u32 %s257_s1, 4  ;;  %s17_s13 = int_to_ptr.vmem [resolvable:$true] %s16_s13  ;;  %s28_s16 = int_to_ptr.hbm [resolvable:$true] %s27_s16 }
   0x4   :  { %s212_s17 = smov 128   ;;  %s213_s18 = smov 8  }
   0x5   :  { %22 = dma.hbm_to_vmem [thread:$0]  %s15_s11, 256, %s17_s13, [#allocation4], %s212_s17, %s212_s17, %s213_s18  }
   0x6   :  { %s214_s19 = smov [#allocation6]  }
   0x7   :  { %s29_s20 = sshll.u32 %s214_s19, 4  ;;  %s30_s20 = int_to_ptr.vmem [resolvable:$true] %s29_s20 }
   0x8   :  { %35 = dma.hbm_to_vmem [thread:$0]  %s28_s16, 512, %s30_s20, [#allocation7], %s212_s17, %s212_s17, %s213_s18  }
   0x9   :  { %205 = dma.done.wait [#allocation4], 256  }
   0xa   :  { %206 = vsyncadd [#allocation4], 4294967040 }
   0xb   :  { %207 = dma.done.wait [#allocation7], 512  }
   0xc   :  { %208 = vsyncadd [#allocation7], 4294966784  ;;  %vm48_vm0 = vcmask 785408   ;;  %v215_v0 = vmov 0.0   ;;  %v58_v1 = vld [vmem:[#allocation6 + $0x18] sm:$0xff]  ;;  %v57_v2 = vld [vmem:[#allocation6 + $0x10] sm:$0xff] }
   0xd   :  { %49 = vst.msk [vmem:[#allocation2] sm:$0xff] %vm48_vm0, %v215_v0  ;;  %78 = vmatpush.msra.mxu0 %v58_v1  ;;  %123 = vmatpush.msra.mxu1 %v58_v1  ;;  %v56_v3 = vld [vmem:[#allocation6 + $0x8] sm:$0xff]  ;;  %v55_v4 = vld [vmem:[#allocation6] sm:$0xff]  ;;  %v53_v5 = vld [vmem:[#allocation3] sm:$0xff]  ;;  %vm59_vm1 = vcmask 261120   ;;  %s216_s0 = smov [#allocation8]  }
   0xe   :  { %50 = vst.msk [vmem:[#allocation2 + $0x8] sm:$0xff] %vm48_vm0, %v215_v0  ;;  %v54_v6 = vld [vmem:[#allocation3 + $0x8] sm:$0xff]  ;;  %s105_s1 = sshll.u32 %s216_s0, 4  ;;  %s107_s23 = sshll.u32 %s258_s2, 4  ;;  %s106_s1 = int_to_ptr.vmem [resolvable:$true] %s105_s1  ;;  %s108_s23 = int_to_ptr.hbm [resolvable:$true] %s107_s23 }
   0xf   :  { %79 = vmatpush.msra.mxu0 %v57_v2  ;;  %124 = vmatpush.msra.mxu1 %v57_v2 }
  0x11   :  { %80 = vmatpush.msra.mxu0 %v56_v3  ;;  %125 = vmatpush.msra.mxu1 %v56_v3 }
  0x13   :  { %81 = vmatpush.msra.mxu0 %v55_v4  ;;  %126 = vmatpush.msra.mxu1 %v55_v4 }
  0x14   :  { %121 = vmatmul.msk.f32.vlgmr.msra.gmra.mxu0 %vm59_vm1, %v53_v5  ;;  %122 = vmatmul.msk.f32.vlgmr.msra.gmra.mxu1 %vm59_vm1, %v54_v6  ;;  %v51_v7 = vld [vmem:[#allocation2] sm:$0xff] }
  0x15   :  { %v52_v8 = vld [vmem:[#allocation2 + $0x8] sm:$0xff] }
  0x91   :  { %v83_v9 = vpop.f32.mrf.mxu0  ;;  %v86_v10 = vpop.f32.mrf.mxu1 }
  0x92   :  { %v89_v11 = vadd.f32 %v83_v9, %v51_v7  ;;  %v90_v12 = vadd.f32 %v86_v10, %v52_v8 }
  0x94   :  { %92 = vst.msk [vmem:[#allocation2] sm:$0xff] %vm48_vm0, %v89_v11 }
  0x95   :  { %93 = vst.msk [vmem:[#allocation2 + $0x8] sm:$0xff] %vm48_vm0, %v90_v12 }
  0x9b   :  { %v97_v13 = vld [vmem:[#allocation2] sm:$0xff] }
  0x9c   :  { %v98_v14 = vld [vmem:[#allocation2 + $0x8] sm:$0xff]  ;;  %99 = vst.msk [vmem:[#allocation8] sm:$0xff] %vm48_vm0, %v97_v13 }
  0x9d   :  { %100 = vst.msk [vmem:[#allocation8 + $0x8] sm:$0xff] %vm48_vm0, %v98_v14 }
  0x9e   :  { %113 = dma.vmem_to_hbm [thread:$0]  %s106_s1, 256, %s108_s23, [#allocation5], %s212_s17, %s212_s17, %s213_s18  }
  0x9f   :  { %209 = dma.done.wait [#allocation5], 256  }
  0xa0   :  { %210 = vsyncadd [#allocation5], 4294967040 }
  0xa1   :  { %118 = vsyncpa [#allocation4], 1 }
  0xa2   :  { %119 = vsyncpa [#allocation7], 1 }
  0xa3   :  { %120 = vsyncpa [#allocation5], 1 }

</bundles_post_ra>
